<compile_context>
chip_gen: v7x
topology: tpu7x:2x2x1
jax: 0.10.0
libtpu: 0.0.40
codegen_flags: <defaults>
</compile_context>

<pallas_src>
import functools

import numpy as np
import jax
import jax.numpy as jnp
from jax.experimental import pallas as pl
from jax.experimental.pallas import tpu as pltpu

LN_EPS = 1e-5   # PyTorch nn.LayerNorm default
LANE = 128


def _round_up(x, m):
    return ((x + m - 1) // m) * m


# --------------------------------- kernel -----------------------------------

def _actor_critic_kernel(x_ref, w1_ref, whid_ref, whead_ref, bias_ref, out_ref,
                         *, h0, hp0, hp1_2, out_w):
    # bias_ref rows: 0=b1, 1=gamma, 2=beta, 3=bah|bch, 4=ba|bc, 5=valid-lane mask.
    x = x_ref[...]                                                # (TB, S) f32 or bf16

    # ---- shared trunk: Linear -> LayerNorm -> ReLU (MXU push #1) ----
    h = jnp.dot(x.astype(jnp.bfloat16), w1_ref[...],
                preferred_element_type=jnp.float32)               # (TB, HP0)
    h = h + bias_ref[0:1, :hp0]

    # LayerNorm over the true hidden width.  Invariant (asserted in init_params):
    # padded lanes of h are exactly 0 pre-LN (w1 pad cols, b1 pad entries are 0), so
    # lane sums over hp0 equal sums over h0; the precomputed 0/1 valid row re-zeroes
    # the pads after centering (no iota/compare/select passes in the kernel).
    inv_h = jnp.float32(1.0 / h0)
    mu = jnp.sum(h, axis=-1, keepdims=True) * inv_h
    hc = (h - mu) * bias_ref[5:6, :hp0]
    var = jnp.sum(hc * hc, axis=-1, keepdims=True) * inv_h
    h = hc * jax.lax.rsqrt(var + LN_EPS)
    h = h * bias_ref[1:2, :hp0] + bias_ref[2:3, :hp0]             # gamma/beta (0 on pad)
    h = jnp.maximum(h, 0.0)

    # ---- fused actor|critic hidden layers (MXU push #2) ----
    ac = jnp.dot(h.astype(jnp.bfloat16), whid_ref[...],
                 preferred_element_type=jnp.float32)              # (TB, 2*HP1)
    ac = jnp.maximum(ac + bias_ref[3:4, :hp1_2], 0.0)

    # ---- fused block-diagonal heads -> narrow (TB, out_w) output (MXU push #3) ----
    out = jnp.dot(ac.astype(jnp.bfloat16), whead_ref[...],
                  preferred_element_type=jnp.float32)             # (TB, out_w)
    out_ref[...] = out + bias_ref[4:5, :out_w]


# --------------------------------- wrapper ----------------------------------

def actor_critic_forward(x, params, *, tile_b=2048, split_min_batch=128):
    """Forward pass: returns (logits, value) for the discrete-action path.

    `x` may be float32 or bfloat16 (bf16 halves the input DMA; no wrapper cast added).
    """
    B, S = x.shape
    h0, hp0, hp1 = params["h0"], params["hp0"], params["hp1"]
    out_w = params["out_w"]
    action_dim = params["action_dim"]

    # Big tiles amortize the ~0.35 us/step pipeline overhead; per-tile VMEM incl.
    # temporaries is only a few MiB at tile_b=2048, far below any generation's VMEM.
    b8 = _round_up(max(B, 1), 8)
    tile_b = _round_up(min(int(tile_b), b8), 8)
    # Guarantee >= 2 grid steps on medium/large batches so "parallel" can shard batch
    # tiles across v7x's two TensorCores (a no-op on single-TC v5e/v6e).
    if B >= split_min_batch and pl.cdiv(B, tile_b) < 2:
        tile_b = _round_up((b8 + 1) // 2, 8)
    grid = (pl.cdiv(B, tile_b),)

    kernel = functools.partial(
        _actor_critic_kernel, h0=h0, hp0=hp0, hp1_2=2 * hp1, out_w=out_w)

    slab_w = params["bias"].shape[1]
    # No batch padding in the wrapper: Pallas clips the partial last block (loads of
    # the overhang are garbage but rows are independent, and overhang stores are
    # never written back).
    fused = pl.pallas_call(
        kernel,
        out_shape=jax.ShapeDtypeStruct((B, out_w), jnp.float32),
        grid_spec=pltpu.PrefetchScalarGridSpec(
            num_scalar_prefetch=0,
            grid=grid,
            in_specs=[
                pl.BlockSpec((tile_b, S), lambda i: (i, 0)),          # batch-tiled state
                # Constant index_maps: weights/bias are DMA'd once and stay resident.
                pl.BlockSpec((S, hp0), lambda i: (0, 0)),
                pl.BlockSpec((hp0, 2 * hp1), lambda i: (0, 0)),
                pl.BlockSpec((2 * hp1, out_w), lambda i: (0, 0)),
                pl.BlockSpec((8, slab_w), lambda i: (0, 0)),          # packed bias slab
            ],
            out_specs=pl.BlockSpec((tile_b, out_w), lambda i: (i, 0)),
        ),
        compiler_params=pltpu.CompilerParams(
            dimension_semantics=("parallel",),        # shard batch tiles across TCs (v7x)
            # Headroom only -- actual VMEM use is a few MiB; tile size is chosen from
            # step-overhead amortization, not from this limit.
            vmem_limit_bytes=32 * 1024 * 1024,
        ),
    )(x, params["w1"], params["whid"], params["whead"], params["bias"])

    # fused is only out_w (=8) lanes wide, so these slices re-read ~32 B/row (negligible
    # next to the input traffic); consumers may also use `fused` directly.
    logits = fused[:, :action_dim]
    value = fused[:, action_dim:action_dim + 1]
    return logits, value


# ---------------------- deterministic parameter init ------------------------

def orthogonal(key, shape, gain):
    """PyTorch-style nn.init.orthogonal_ for a (out, in) weight matrix."""
    rows, cols = shape
    flat = jax.random.normal(key, (rows, cols), dtype=jnp.float32)
    if rows < cols:
        flat = flat.T
    q, r = jnp.linalg.qr(flat)
    q = q * jnp.sign(jnp.diag(r))
    if rows < cols:
        q = q.T
    return gain * q


def init_params(key, state_dim, action_dim, hidden_dims):
    assert len(hidden_dims) == 2, "kernel implements hidden_dims=[H0, H1] (one shared block)"
    h0, h1 = hidden_dims
    hp0 = _round_up(h0, LANE)
    hp1 = _round_up(h1, LANE)
    out_w = _round_up(action_dim + 1, 8)      # narrow fused output: logits | value | pad
    slab_w = max(hp0, 2 * hp1, out_w)

    keys = jax.random.split(key, 12)
    sqrt2 = float(np.sqrt(2.0))

    # PyTorch weight layout (out, in) -> transpose to (in, out) for y = x @ W.
    w1 = np.asarray(orthogonal(keys[0], (h0, state_dim), sqrt2)).T
    wah = np.asarray(orthogonal(keys[1], (h1, h0), sqrt2)).T
    wch = np.asarray(orthogonal(keys[2], (h1, h0), sqrt2)).T
    wa = np.asarray(orthogonal(keys[3], (action_dim, h1), 0.01)).T
    wc = np.asarray(orthogonal(keys[4], (1, h1), 1.0)).T

    # PyTorch init uses zero biases / unit gammas; randomize slightly here so the
    # self-test exercises every parameter path of the kernel.
    b1 = 0.1 * np.asarray(jax.random.normal(keys[5], (h0,), jnp.float32))
    g1 = 1.0 + 0.1 * np.asarray(jax.random.normal(keys[6], (h0,), jnp.float32))
    beta1 = 0.1 * np.asarray(jax.random.normal(keys[7], (h0,), jnp.float32))
    bah = 0.1 * np.asarray(jax.random.normal(keys[8], (h1,), jnp.float32))
    bch = 0.1 * np.asarray(jax.random.normal(keys[9], (h1,), jnp.float32))
    ba = 0.1 * np.asarray(jax.random.normal(keys[10], (action_dim,), jnp.float32))
    bc = 0.1 * np.asarray(jax.random.normal(keys[11], (1,), jnp.float32))

    # ---- packed / padded kernel parameters ----
    w1_p = np.zeros((state_dim, hp0), np.float32); w1_p[:, :h0] = w1
    whid = np.zeros((hp0, 2 * hp1), np.float32)
    whid[:h0, :h1] = wah
    whid[:h0, hp1:hp1 + h1] = wch
    whead = np.zeros((2 * hp1, out_w), np.float32)
    whead[:h1, :action_dim] = wa
    whead[hp1:hp1 + h1, action_dim] = wc[:, 0]
    bias = np.zeros((8, slab_w), np.float32)
    bias[0, :h0] = b1
    bias[1, :h0] = g1
    bias[2, :h0] = beta1
    bias[3, :h1] = bah
    bias[3, hp1:hp1 + h1] = bch
    bias[4, :action_dim] = ba
    bias[4, action_dim] = bc[0]
    bias[5, :h0] = 1.0                         # 0/1 valid-lane mask used by LayerNorm

    # LayerNorm correctness invariant: padded lanes of w1 columns, b1, gamma, beta
    # must be exactly zero (in-kernel mean/var scale by 1/h0 while sums span hp0).
    assert np.all(w1_p[:, h0:] == 0.0)
    assert np.all(bias[0:3, h0:hp0] == 0.0)
    assert np.all(bias[5, :h0] == 1.0) and np.all(bias[5, h0:] == 0.0)

    return {
        "w1": jnp.asarray(w1_p, jnp.bfloat16),
        "whid": jnp.asarray(whid, jnp.bfloat16),
        "whead": jnp.asarray(whead, jnp.bfloat16),
        "bias": jnp.asarray(bias, jnp.float32),
        "h0": h0, "hp0": hp0, "hp1": hp1, "out_w": out_w,
        "action_dim": action_dim,
        "raw": {
            "w1": jnp.asarray(w1), "b1": jnp.asarray(b1)[None, :],
            "g1": jnp.asarray(g1)[None, :], "beta1": jnp.asarray(beta1)[None, :],
            "wah": jnp.asarray(wah), "bah": jnp.asarray(bah)[None, :],
            "wch": jnp.asarray(wch), "bch": jnp.asarray(bch)[None, :],
            "wa": jnp.asarray(wa), "ba": jnp.asarray(ba)[None, :],
            "wc": jnp.asarray(wc), "bc": jnp.asarray(bc)[None, :],
        },
    }


def reference_forward(x, raw, matmul_dtype=jnp.float32):
    """Plain-JAX reference of the PyTorch forward (discrete path)."""
    def mm(a, w):
        return jnp.dot(a.astype(matmul_dtype), w.astype(matmul_dtype),
                       preferred_element_type=jnp.float32)
    h = mm(x, raw["w1"]) + raw["b1"]
    mu = jnp.mean(h, axis=-1, keepdims=True)
    var = jnp.mean((h - mu) ** 2, axis=-1, keepdims=True)
    h = (h - mu) * jax.lax.rsqrt(var + LN_EPS) * raw["g1"] + raw["beta1"]
    h = jnp.maximum(h, 0.0)
    af = jnp.maximum(mm(h, raw["wah"]) + raw["bah"], 0.0)
    logits = mm(af, raw["wa"]) + raw["ba"]
    cf = jnp.maximum(mm(h, raw["wch"]) + raw["bch"], 0.0)
    value = mm(cf, raw["wc"]) + raw["bc"]
    return logits, value


if __name__ == "__main__":
    state_dim, action_dim = 16, 4
    hidden_dims = [32, 32]

    key = jax.random.PRNGKey(0)
    k_params, k_x1, k_x2, k_x3 = jax.random.split(key, 4)
    params = init_params(k_params, state_dim, action_dim, hidden_dims)

    # Small batch: single exact grid step.
    x = jax.random.normal(k_x1, (8, state_dim), dtype=jnp.float32)
    logits, value = actor_critic_forward(x, params)
    jax.block_until_ready((logits, value))
    assert logits.shape == (8, action_dim) and value.shape == (8, 1)

    # Tight check vs. reference using the same bf16-at-dot numerics.
    rl, rv = reference_forward(x, params["raw"], jnp.bfloat16)
    np.testing.assert_allclose(np.asarray(logits), np.asarray(rl), atol=2e-3, rtol=2e-3)
    np.testing.assert_allclose(np.asarray(value), np.asarray(rv), atol=2e-3, rtol=2e-3)
    # Loose check vs. the full-f32 PyTorch-equivalent forward.
    rl32, rv32 = reference_forward(x, params["raw"], jnp.float32)
    np.testing.assert_allclose(np.asarray(logits), np.asarray(rl32), atol=5e-2, rtol=5e-2)
    np.testing.assert_allclose(np.asarray(value), np.asarray(rv32), atol=5e-2, rtol=5e-2)

    # Larger batch: exercises the 2-step grid (v7x TC split) and the clipped partial
    # last block (no wrapper-side jnp.pad anymore).
    x2 = jax.random.normal(k_x2, (1000, state_dim), dtype=jnp.float32)
    l2, v2 = actor_critic_forward(x2, params)
    jax.block_until_ready((l2, v2))
    r2l, r2v = reference_forward(x2, params["raw"], jnp.bfloat16)
    np.testing.assert_allclose(np.asarray(l2), np.asarray(r2l), atol=2e-3, rtol=2e-3)
    np.testing.assert_allclose(np.asarray(v2), np.asarray(r2v), atol=2e-3, rtol=2e-3)

    # bf16 state straight into the kernel (halves input DMA; no wrapper-side cast).
    x2b = x2.astype(jnp.bfloat16)
    l2b, v2b = actor_critic_forward(x2b, params)
    jax.block_until_ready((l2b, v2b))
    r2bl, r2bv = reference_forward(x2b.astype(jnp.float32), params["raw"], jnp.bfloat16)
    np.testing.assert_allclose(np.asarray(l2b), np.asarray(r2bl), atol=2e-3, rtol=2e-3)
    np.testing.assert_allclose(np.asarray(v2b), np.asarray(r2bv), atol=2e-3, rtol=2e-3)

    # Ragged tiny batch (B=3): block overhangs the whole array; clipped stores only.
    x3 = jax.random.normal(k_x3, (3, state_dim), dtype=jnp.float32)
    l3, v3 = actor_critic_forward(x3, params)
    jax.block_until_ready((l3, v3))
    r3l, r3v = reference_forward(x3, params["raw"], jnp.bfloat16)
    np.testing.assert_allclose(np.asarray(l3), np.asarray(r3l), atol=2e-3, rtol=2e-3)
    np.testing.assert_allclose(np.asarray(v3), np.asarray(r3v), atol=2e-3, rtol=2e-3)

    print("KERNEL_OK")
</pallas_src>

<mosaic_0001>
module attributes {stable_mosaic.version = 11 : i64} {
  func.func @_actor_critic_kernel(%arg0: i32, %arg1: memref<8x16xf32, #tpu.memory_space<vmem>>, %arg2: memref<16x128xbf16, #tpu.memory_space<vmem>>, %arg3: memref<128x256xbf16, #tpu.memory_space<vmem>>, %arg4: memref<256x8xbf16, #tpu.memory_space<vmem>>, %arg5: memref<8x256xf32, #tpu.memory_space<vmem>>, %arg6: memref<8x8xf32, #tpu.memory_space<vmem>>) attributes {dimension_semantics = [#tpu.dimension_semantics<parallel>], iteration_bounds = array<i64: 1>, scalar_prefetch = 0 : i64, scratch_operands = 0 : i64, tpu.core_type = #tpu.core_type<tc>, window_params = [{transform_indices = @transform_0, window_bounds = array<i64: 8, 16>}, {pipeline_mode = #tpu.pipeline_mode<synchronous>, transform_indices = @transform_1, window_bounds = array<i64: 16, 128>}, {pipeline_mode = #tpu.pipeline_mode<synchronous>, transform_indices = @transform_2, window_bounds = array<i64: 128, 256>}, {pipeline_mode = #tpu.pipeline_mode<synchronous>, transform_indices = @transform_3, window_bounds = array<i64: 256, 8>}, {pipeline_mode = #tpu.pipeline_mode<synchronous>, transform_indices = @transform_4, window_bounds = array<i64: 8, 256>}, {transform_indices = @transform_5, window_bounds = array<i64: 8, 8>}]} {
    %c0 = arith.constant 0 : index
    %c0_0 = arith.constant 0 : index
    %0 = vector.load %arg1[%c0, %c0_0] : memref<8x16xf32, #tpu.memory_space<vmem>>, vector<8x16xf32>
    %1 = arith.truncf %0 : vector<8x16xf32> to vector<8x16xbf16>
    %c0_1 = arith.constant 0 : index
    %c0_2 = arith.constant 0 : index
    %2 = vector.load %arg2[%c0_1, %c0_2] : memref<16x128xbf16, #tpu.memory_space<vmem>>, vector<16x128xbf16>
    %cst = arith.constant dense<0.000000e+00> : vector<8x128xf32>
    %3 = tpu.matmul %1, %2, %cst {dimension_numbers = #tpu.dot_dimension_numbers<[1], [0], [0], [1], [0, 0, 1, 1], [], []>} : vector<8x16xbf16>, vector<16x128xbf16>, vector<8x128xf32> -> vector<8x128xf32>
    %c0_3 = arith.constant 0 : index
    %c0_4 = arith.constant 0 : index
    %4 = vector.load %arg5[%c0_3, %c0_4] : memref<8x256xf32, #tpu.memory_space<vmem>>, vector<1x128xf32>
    %5 = vector.broadcast %4 : vector<1x128xf32> to vector<8x128xf32>
    %6 = arith.addf %3, %5 : vector<8x128xf32>
    %cst_5 = arith.constant dense<0.000000e+00> : vector<8xf32>
    %7 = vector.multi_reduction <add>, %6, %cst_5 [1] : vector<8x128xf32> to vector<8xf32>
    %8 = vector.shape_cast %7 : vector<8xf32> to vector<8x1xf32>
    %cst_6 = arith.constant 3.125000e-02 : f32
    %9 = vector.broadcast %cst_6 : f32 to vector<8x1xf32>
    %10 = arith.mulf %8, %9 : vector<8x1xf32>
    %11 = vector.broadcast %10 : vector<8x1xf32> to vector<8x128xf32>
    %12 = arith.subf %6, %11 : vector<8x128xf32>
    %c5 = arith.constant 5 : index
    %c0_7 = arith.constant 0 : index
    %13 = vector.load %arg5[%c5, %c0_7] : memref<8x256xf32, #tpu.memory_space<vmem>>, vector<1x128xf32>
    %14 = vector.broadcast %13 : vector<1x128xf32> to vector<8x128xf32>
    %15 = arith.mulf %12, %14 : vector<8x128xf32>
    %16 = arith.mulf %15, %15 : vector<8x128xf32>
    %cst_8 = arith.constant dense<0.000000e+00> : vector<8xf32>
    %17 = vector.multi_reduction <add>, %16, %cst_8 [1] : vector<8x128xf32> to vector<8xf32>
    %18 = vector.shape_cast %17 : vector<8xf32> to vector<8x1xf32>
    %cst_9 = arith.constant 3.125000e-02 : f32
    %19 = vector.broadcast %cst_9 : f32 to vector<8x1xf32>
    %20 = arith.mulf %18, %19 : vector<8x1xf32>
    %cst_10 = arith.constant 9.99999974E-6 : f32
    %21 = vector.broadcast %cst_10 : f32 to vector<8x1xf32>
    %22 = arith.addf %20, %21 : vector<8x1xf32>
    %23 = math.rsqrt %22 : vector<8x1xf32>
    %24 = vector.broadcast %23 : vector<8x1xf32> to vector<8x128xf32>
    %25 = arith.mulf %15, %24 : vector<8x128xf32>
    %c1 = arith.constant 1 : index
    %c0_11 = arith.constant 0 : index
    %26 = vector.load %arg5[%c1, %c0_11] : memref<8x256xf32, #tpu.memory_space<vmem>>, vector<1x128xf32>
    %27 = vector.broadcast %26 : vector<1x128xf32> to vector<8x128xf32>
    %28 = arith.mulf %25, %27 : vector<8x128xf32>
    %c2 = arith.constant 2 : index
    %c0_12 = arith.constant 0 : index
    %29 = vector.load %arg5[%c2, %c0_12] : memref<8x256xf32, #tpu.memory_space<vmem>>, vector<1x128xf32>
    %30 = vector.broadcast %29 : vector<1x128xf32> to vector<8x128xf32>
    %31 = arith.addf %28, %30 : vector<8x128xf32>
    %cst_13 = arith.constant 0.000000e+00 : f32
    %32 = vector.broadcast %cst_13 : f32 to vector<8x128xf32>
    %33 = arith.maximumf %31, %32 : vector<8x128xf32>
    %34 = arith.truncf %33 : vector<8x128xf32> to vector<8x128xbf16>
    %c0_14 = arith.constant 0 : index
    %c0_15 = arith.constant 0 : index
    %35 = vector.load %arg3[%c0_14, %c0_15] : memref<128x256xbf16, #tpu.memory_space<vmem>>, vector<128x256xbf16>
    %cst_16 = arith.constant dense<0.000000e+00> : vector<8x256xf32>
    %36 = tpu.matmul %34, %35, %cst_16 {dimension_numbers = #tpu.dot_dimension_numbers<[1], [0], [0], [1], [0, 0, 1, 1], [], []>} : vector<8x128xbf16>, vector<128x256xbf16>, vector<8x256xf32> -> vector<8x256xf32>
    %c3 = arith.constant 3 : index
    %c0_17 = arith.constant 0 : index
    %37 = vector.load %arg5[%c3, %c0_17] : memref<8x256xf32, #tpu.memory_space<vmem>>, vector<1x256xf32>
    %38 = vector.broadcast %37 : vector<1x256xf32> to vector<8x256xf32>
    %39 = arith.addf %36, %38 : vector<8x256xf32>
    %cst_18 = arith.constant 0.000000e+00 : f32
    %40 = vector.broadcast %cst_18 : f32 to vector<8x256xf32>
    %41 = arith.maximumf %39, %40 : vector<8x256xf32>
    %42 = arith.truncf %41 : vector<8x256xf32> to vector<8x256xbf16>
    %c0_19 = arith.constant 0 : index
    %c0_20 = arith.constant 0 : index
    %43 = vector.load %arg4[%c0_19, %c0_20] : memref<256x8xbf16, #tpu.memory_space<vmem>>, vector<256x8xbf16>
    %cst_21 = arith.constant dense<0.000000e+00> : vector<8x8xf32>
    %44 = tpu.matmul %42, %43, %cst_21 {dimension_numbers = #tpu.dot_dimension_numbers<[1], [0], [0], [1], [0, 0, 1, 1], [], []>} : vector<8x256xbf16>, vector<256x8xbf16>, vector<8x8xf32> -> vector<8x8xf32>
    %c4 = arith.constant 4 : index
    %c0_22 = arith.constant 0 : index
    %45 = vector.load %arg5[%c4, %c0_22] : memref<8x256xf32, #tpu.memory_space<vmem>>, vector<1x8xf32>
    %46 = vector.broadcast %45 : vector<1x8xf32> to vector<8x8xf32>
    %47 = arith.addf %44, %46 : vector<8x8xf32>
    %c0_23 = arith.constant 0 : index
    %c0_24 = arith.constant 0 : index
    %48 = vector.load %arg6[%c0_23, %c0_24] : memref<8x8xf32, #tpu.memory_space<vmem>>, vector<8x8xf32>
    tpu.vector_store %arg6[%c0_23, %c0_24], %47 {strides = array<i32>} : memref<8x8xf32, #tpu.memory_space<vmem>>, vector<8x8xf32>,
    return
  }
  func.func @transform_0(%arg0: i32) -> (i32, i32) {
    %c0_i32 = arith.constant 0 : i32
    %c0_i32_0 = arith.constant 0 : i32
    return %arg0, %c0_i32 : i32, i32
  }
  func.func @transform_1(%arg0: i32) -> (i32, i32) {
    %c0_i32 = arith.constant 0 : i32
    %c0_i32_0 = arith.constant 0 : i32
    %c0_i32_1 = arith.constant 0 : i32
    return %c0_i32, %c0_i32_0 : i32, i32
  }
  func.func @transform_2(%arg0: i32) -> (i32, i32) {
    %c0_i32 = arith.constant 0 : i32
    %c0_i32_0 = arith.constant 0 : i32
    %c0_i32_1 = arith.constant 0 : i32
    return %c0_i32, %c0_i32_0 : i32, i32
  }
  func.func @transform_3(%arg0: i32) -> (i32, i32) {
    %c0_i32 = arith.constant 0 : i32
    %c0_i32_0 = arith.constant 0 : i32
    %c0_i32_1 = arith.constant 0 : i32
    return %c0_i32, %c0_i32_0 : i32, i32
  }
  func.func @transform_4(%arg0: i32) -> (i32, i32) {
    %c0_i32 = arith.constant 0 : i32
    %c0_i32_0 = arith.constant 0 : i32
    %c0_i32_1 = arith.constant 0 : i32
    return %c0_i32, %c0_i32_0 : i32, i32
  }
  func.func @transform_5(%arg0: i32) -> (i32, i32) {
    %c0_i32 = arith.constant 0 : i32
    %c0_i32_0 = arith.constant 0 : i32
    return %arg0, %c0_i32 : i32, i32
  }
}

</mosaic_0001>

<bundles_post_ra>
// kernel: tpu_custom_call.1
= control target key start
LH: loop header
LB: loop body
LE: loop exit
PB: predicated region body
PF: predicated region fallthrough
CT: control target
= control target key end

     0   :  { %10 = vsyncpa [#allocation3], 0  ;;  %s846_s0 = inlined_call_operand.hbm [shape: f32[8,16], index: 0, kind: input, shape index: {}]   ;;  %s847_s1 = inlined_call_operand.hbm [shape: bf16[16,128], index: 1, kind: input, shape index: {}]   ;;  %s848_s2 = inlined_call_operand.vmem [shape: bf16[128,256], index: 2, kind: input, shape index: {}]   ;;  %s849_s3 = inlined_call_operand.vmem [shape: bf16[256,8], index: 3, kind: input, shape index: {}]   ;;  %s850_s4 = inlined_call_operand.vmem [shape: f32[8,256], index: 4, kind: input, shape index: {}]   ;;  %s851_s5 = inlined_call_operand.hbm [shape: f32[8,8], index: 5, kind: output, shape index: {}]  }
   0x1   :  { %11 = vsyncpa [#allocation6], 0 }
   0x2   :  { %12 = vsyncpa [#allocation4], 0  ;;  %s651_s18 = smov [#allocation2]   ;;  %s652_s20 = smov [#allocation5]  }
   0x3   :  { %s19_s19 = sshll.u32 %s651_s18, 4  ;;  %s28_s21 = sshll.u32 %s652_s20, 4  ;;  %s20_s19 = int_to_ptr.vmem [resolvable:$true] %s19_s19  ;;  %s689_s21 = int_to_ptr.vmem [resolvable:$true] %s28_s21 }
   0x4   :  { %s579_s24 = scalar_lea.hbm %s846_s0, 128 }
   0x5   :  { %p580_p0 = scmp.ne.s32.totalorder %s846_s0, %s579_s24  ;;  %p583_p1 = scmp.lt.u32.totalorder %s579_s24, %s846_s0 }
   0x7   :  { %p585_p2 = pnand %p583_p1, %p580_p0 }
   0x9   :  { %588 = shalt.err (!%p585_p2)
}
   0xa   :  { %s589_s29 = scalar_lea.vmem %s20_s19, 128  ;;  %p594_p4 = scmp.lt.s32.totalorder %s20_s19, %s20_s19 }
   0xb   :  { %p590_p3 = scmp.ne.s32.totalorder %s20_s19, %s589_s29  ;;  %p595_p5 = scmp.lt.s32.totalorder %s589_s29, %s589_s29 }
   0xd   :  { %p596_p6 = por %p595_p5, %p594_p4 }
   0xf   :  { %p597_p7 = pnand %p596_p6, %p590_p3 }
  0x11   :  { %600 = shalt.err (!%p597_p7)
}
  0x12   :  { %22 = dma.hbm_to_vmem [thread:$0]  %s846_s0, 128, %s20_s19, [#allocation3]  }
  0x13   :  { %s601_s9 = scalar_lea.hbm %s847_s1, 128 }
  0x14   :  { %p602_p8 = scmp.ne.s32.totalorder %s847_s1, %s601_s9  ;;  %p605_p9 = scmp.lt.u32.totalorder %s601_s9, %s847_s1 }
  0x16   :  { %p607_p10 = pnand %p605_p9, %p602_p8 }
  0x18   :  { %610 = shalt.err (!%p607_p10)
}
  0x19   :  { %s611_s14 = scalar_lea.vmem %s689_s21, 128  ;;  %p616_p12 = scmp.lt.s32.totalorder %s689_s21, %s689_s21 }
  0x1a   :  { %p612_p11 = scmp.ne.s32.totalorder %s689_s21, %s611_s14  ;;  %p617_p13 = scmp.lt.s32.totalorder %s611_s14, %s611_s14 }
  0x1c   :  { %p618_p0 = por %p617_p13, %p616_p12 }
  0x1e   :  { %p619_p1 = pnand %p618_p0, %p612_p11 }
  0x20   :  { %622 = shalt.err (!%p619_p1)
}
  0x21   :  { %s653_s0 = smov 64   ;;  %s654_s15 = smov 4  }
  0x22   :  { %34 = dma.hbm_to_vmem [thread:$0]  %s847_s1, 128, %s689_s21, [#allocation6], %s653_s0, %s653_s0, %s654_s15  }
  0x23   :  { %645 = dma.done.wait [#allocation3], 128  }
  0x24   :  { %646 = vsyncadd [#allocation3], 4294967168 }
  0x25   :  { %647 = dma.done.wait [#allocation6], 128  }
  0x26   :  { %648 = vsyncadd [#allocation6], 4294967168  ;;  %v655_v0 = vmov 0.0   ;;  %vm656_vm0 = vmmov 0   ;;  %v536_v1 = vld [vmem:[#allocation5] sm:$0xff]   ;;  %v48_v2 = vld [vmem:[#allocation2] sm:$0xff]  ;;  %v141_v60 = vlaneseq }
  0x27   :  { %522 = vmatprep.subr.bf16.mxu0 %v655_v0  ;;  %524 = vmatprep.mubr.msk.bf16.mxu0 %vm656_vm0, %v655_v0  ;;  %v49_v3 = vpack.c.bf16 %v48_v2, %v48_v2  ;;  %vm59_vm1 = vcmask 130048   ;;  %v52_v4 = vld [vmem:[%s850_s4] ss:$0 sm:$0xff]  ;;  %v537_v10 = vld [vmem:[%s848_s2 + $0x4] ss:$8 sps:$4 sm:$0xff]   ;;  %v657_v27 = vmov 0  }
  0x28   :  { %523 = vmatpush3.bf16.msra.mxu0 %v536_v1  ;;  %v539_v11 = vld [vmem:[%s848_s2] ss:$8 sps:$4 sm:$0xff]   ;;  %v540_v12 = vld [vmem:[%s848_s2 + $0x14] ss:$8 sps:$4 sm:$0xff]   ;;  %231 = vmatprep.subr.bf16.mxu1 %v537_v10  ;;  %v542_v13 = vld [vmem:[%s848_s2 + $0x10] ss:$8 sps:$4 sm:$0xff]  }
  0x29   :  { %232 = vmatpush1.bf16.msra.mxu1 %v539_v11  ;;  %v107_v16 = vld [vmem:[%s850_s4 + $0x5] ss:$0 sm:$0xff]  ;;  %v545_v21 = vld [vmem:[%s848_s2 + $0x20] ss:$8 sps:$4 sm:$0xff]   ;;  %v546_v22 = vld [vmem:[%s848_s2 + $0x34] ss:$8 sps:$4 sm:$0xff]   ;;  %263 = vmatprep.mubr.bf16.mxu1 %v657_v27 }
  0x2a   :  { %233 = vmatprep.subr.bf16.mxu1 %v540_v12  ;;  %v543_v20 = vld [vmem:[%s848_s2 + $0x24] ss:$8 sps:$4 sm:$0xff]   ;;  %v548_v23 = vld [vmem:[%s848_s2 + $0x30] ss:$8 sps:$4 sm:$0xff]   ;;  %v551_v25 = vld [vmem:[%s848_s2 + $0x40] ss:$8 sps:$4 sm:$0xff]  }
  0x2b   :  { %525 = vmatmul.mubr.msk.bf16.vlgmr.msra.gmra.mrb[0].mxu0 %vm59_vm1, %v49_v3  ;;  %v549_v24 = vld [vmem:[%s848_s2 + $0x44] ss:$8 sps:$4 sm:$0xff]   ;;  %v552_v26 = vld [vmem:[%s848_s2 + $0x54] ss:$8 sps:$4 sm:$0xff]   ;;  %v554_v28 = vld [vmem:[%s848_s2 + $0x50] ss:$8 sps:$4 sm:$0xff]  }
  0x2c   :  { %v555_v29 = vld [vmem:[%s848_s2 + $0x64] ss:$8 sps:$4 sm:$0xff]   ;;  %v557_v30 = vld [vmem:[%s848_s2 + $0x60] ss:$8 sps:$4 sm:$0xff]   ;;  %v558_v31 = vld [vmem:[%s848_s2 + $0x74] ss:$8 sps:$4 sm:$0xff]  }
  0x2d   :  { %234 = vmatpush1.bf16.msra.mxu1 %v542_v13  ;;  %v560_v32 = vld [vmem:[%s848_s2 + $0x70] ss:$8 sps:$4 sm:$0xff]   ;;  %v561_v33 = vld [vmem:[%s849_s3 + $0x40] sm:$0xff]   ;;  %v563_v35 = vld [vmem:[%s849_s3 + $0x48] sm:$0xff]   ;;  %v142_v61 = vshrl.u32 %v141_v60, 7  ;;  %s658_s11 = smov [#allocation7]  }
  0x2e   :  { %235 = vmatprep.subr.bf16.mxu1 %v543_v20  ;;  %v562_v34 = vld [vmem:[%s849_s3] sm:$0xff]   ;;  %500 = vmatprep.subr.bf16.mxu0 %v561_v33  ;;  %v564_v36 = vld [vmem:[%s849_s3 + $0x8] sm:$0xff]   ;;  %v565_v37 = vld [vmem:[%s849_s3 + $0x50] sm:$0xff]   ;;  %s453_s12 = sshll.u32 %s658_s11, 4  ;;  %vm445_vm2 = vcmask 64512   ;;  %s454_s12 = int_to_ptr.vmem [resolvable:$true] %s453_s12 }
  0x2f   :  { %501 = vmatpush3.bf16.msra.mxu0 %v562_v34  ;;  %v566_v38 = vld [vmem:[%s849_s3 + $0x10] sm:$0xff]   ;;  %v567_v39 = vld [vmem:[%s849_s3 + $0x58] sm:$0xff]   ;;  %v569_v41 = vld [vmem:[%s849_s3 + $0x60] sm:$0xff]   ;;  %v143_v62 = vsub.s32 0, %v142_v61  ;;  %v147_v0 = vsub.s32 1, %v142_v61  ;;  %s623_s13 = scalar_lea.vmem %s454_s12, 128  ;;  %p628_p3 = scmp.lt.s32.totalorder %s454_s12, %s454_s12 }
  0x30   :  { %502 = vmatprep.subr.bf16.mxu0 %v563_v35  ;;  %v568_v40 = vld [vmem:[%s849_s3 + $0x18] sm:$0xff]   ;;  %v570_v42 = vld [vmem:[%s849_s3 + $0x20] sm:$0xff]   ;;  %v571_v43 = vld [vmem:[%s849_s3 + $0x68] sm:$0xff]   ;;  %p624_p2 = scmp.ne.s32.totalorder %s454_s12, %s623_s13  ;;  %p629_p4 = scmp.lt.s32.totalorder %s623_s13, %s623_s13 }
  0x31   :  { %236 = vmatpush1.bf16.msra.mxu1 %v545_v21  ;;  %v572_v44 = vld [vmem:[%s849_s3 + $0x28] sm:$0xff]   ;;  %v116_v49 = vld [vmem:[%s850_s4 + $0x1] ss:$0 sm:$0xff]  ;;  %v118_v51 = vld [vmem:[%s850_s4 + $0x2] ss:$0 sm:$0xff] }
  0x32   :  { %237 = vmatprep.subr.bf16.mxu1 %v546_v22  ;;  %v573_v56 = vld [vmem:[%s849_s3 + $0x70] sm:$0xff]   ;;  %v575_v58 = vld [vmem:[%s849_s3 + $0x78] sm:$0xff]   ;;  %v465_v63 = vld [vmem:[%s850_s4 + $0x3] ss:$8 sm:$0x3]  ;;  %p630_p5 = por %p629_p4, %p628_p3 }
  0x33   :  { %503 = vmatpush3.bf16.msra.mxu0 %v564_v36  ;;  %v574_v57 = vld [vmem:[%s849_s3 + $0x30] sm:$0xff]   ;;  %v576_v59 = vld [vmem:[%s849_s3 + $0x38] sm:$0xff]   ;;  %v144_v1 = vrot.slane %v465_v63, %v143_v62  ;;  %v148_v2 = vrot.slane %v465_v63, %v147_v0 }
  0x34   :  { %504 = vmatprep.subr.bf16.mxu0 %v565_v37  ;;  %p631_p6 = pnand %p630_p5, %p624_p2 }
  0x35   :  { %238 = vmatpush1.bf16.msra.mxu1 %v548_v23 }
  0x36   :  { %239 = vmatprep.subr.bf16.mxu1 %v549_v24 }
  0x37   :  { %505 = vmatpush3.bf16.msra.mxu0 %v566_v38 }
  0x38   :  { %506 = vmatprep.subr.bf16.mxu0 %v567_v39 }
  0x39   :  { %240 = vmatpush1.bf16.msra.mxu1 %v551_v25 }
  0x3a   :  { %241 = vmatprep.subr.bf16.mxu1 %v552_v26 }
  0x3b   :  { %507 = vmatpush3.bf16.msra.mxu0 %v568_v40 }
  0x3c   :  { %508 = vmatprep.subr.bf16.mxu0 %v569_v41 }
  0x3d   :  { %242 = vmatpush1.bf16.msra.mxu1 %v554_v28 }
  0x3e   :  { %243 = vmatprep.subr.bf16.mxu1 %v555_v29 }
  0x3f   :  { %509 = vmatpush3.bf16.msra.mxu0 %v570_v42 }
  0x40   :  { %510 = vmatprep.subr.bf16.mxu0 %v571_v43 }
  0x41   :  { %244 = vmatpush1.bf16.msra.mxu1 %v557_v30 }
  0x42   :  { %245 = vmatprep.subr.bf16.mxu1 %v558_v31 }
  0x43   :  { %511 = vmatpush3.bf16.msra.mxu0 %v572_v44 }
  0x44   :  { %512 = vmatprep.subr.bf16.mxu0 %v573_v56 }
  0x45   :  { %246 = vmatpush1.bf16.msra.mxu1 %v560_v32 }
  0x47   :  { %513 = vmatpush3.bf16.msra.mxu0 %v574_v57 }
  0x48   :  { %514 = vmatprep.subr.bf16.mxu0 %v575_v58 }
  0x4b   :  { %515 = vmatpush3.bf16.msra.mxu0 %v576_v59 }
  0xfe   :  { %v97_v5 = vpop.f32.mrb[0].mxu0 }
  0xff   :  { %v98_v6 = vadd.f32 %v97_v5, %v52_v4  ;;  %v526_v7 = vpop.f32.mrb[1].mxu0 }
 0x100   :  { %v100_v8 = vpop.f32.mrb[2].mxu0 }
 0x101   :  { %103 = vadd.xlane.f32.xlu0 %v98_v6  ;;  %v527_v9 = vpop.f32.mrb[3].mxu0 }
 0x18e   :  { %v104_v14 = vpop.xlane.xlu0 %103 }
 0x18f   :  { %v105_v15 = vmul.f32 0.03125, %v104_v14  ;;  %v308_v14 = vld [vmem:[%s850_s4 + $0x4] ss:$0 sm:$0xff] }
 0x191   :  { %v106_v17 = vsub.f32 %v98_v6, %v105_v15 }
 0x193   :  { %v108_v18 = vmul.f32 %v107_v16, %v106_v17 }
 0x195   :  { %v109_v19 = vmul.f32 %v108_v18, %v108_v18 }
 0x197   :  { %110 = vadd.xlane.f32.xlu0 %v109_v19 }
 0x224   :  { %v111_v45 = vpop.xlane.xlu0 %110 }
 0x225   :  { %v112_v46 = vmul.f32 0.03125, %v111_v45 }
 0x227   :  { %v113_v47 = vadd.f32 1e-05, %v112_v46 }
 0x229   :  { %577 = vrsqrt.f32 %v113_v47 }
 0x233   :  { %v578_v48 = vpop.eup %577 }
 0x234   :  { %v115_v50 = vmul.f32 %v578_v48, %v108_v18 }
 0x236   :  { %v117_v52 = vmul.f32 %v116_v49, %v115_v50 }
 0x238   :  { %v119_v53 = vadd.f32 %v118_v51, %v117_v52 }
 0x23a   :  { %v120_v54 = vmax.f32 %v119_v53, 0.0 }
 0x23c   :  { %v121_v55 = vpack.c.bf16 %v120_v54, %v120_v54 }
 0x23e   :  { %264 = vmatmul.mubr.bf16.vlgmr.msra.gmra.mrb[0].mxu1 %v121_v55 }
 0x311   :  { %v265_v3 = vpop.f32.mrb[0].mxu1 }
 0x312   :  { %v266_v4 = vadd.f32 %v265_v3, %v144_v1  ;;  %v267_v5 = vpop.f32.mrb[1].mxu1 }
 0x313   :  { %v268_v6 = vadd.f32 %v267_v5, %v148_v2  ;;  %v269_v7 = vpop.f32.mrb[2].mxu1 }
 0x314   :  { %v272_v8 = vmax.f32 %v266_v4, 0.0  ;;  %v270_v9 = vpop.f32.mrb[3].mxu1 }
 0x315   :  { %v273_v10 = vmax.f32 %v268_v6, 0.0 }
 0x316   :  { %v274_v12 = vpack.c.bf16 %v272_v8, %v272_v8 }
 0x317   :  { %v275_v11 = vpack.c.bf16 %v273_v10, %v273_v10 }
 0x319   :  { %437 = vmatprep.mubr.bf16.mxu0 %v275_v11 }
 0x31a   :  { %438 = vmatmul.mubr.bf16.vlgmr.msra.gmra.mrb[4].mxu0 %v274_v12 }
 0x3ed   :  { %v516_v13 = vpop.f32.mrb[4].mxu0 }
 0x3ee   :  { %v517_v15 = vpop.f32.mrb[5].mxu0 }
 0x3ef   :  { %v518_v16 = vadd.f32 %v517_v15, %v516_v13  ;;  %v519_v17 = vpop.f32.mrb[6].mxu0 }
 0x3f0   :  { %v520_v18 = vpop.f32.mrb[7].mxu0 }
 0x3f1   :  { %v440_v19 = vadd.f32 %v518_v16, %v308_v14 }
 0x3f3   :  { %446 = vst.msk [vmem:[#allocation7] sm:$0xff] %vm445_vm2, %v440_v19 }
 0x3f4   :  { %634 = shalt.err (!%p631_p6)
}
 0x3f5   :  { %s635_s4 = scalar_lea.hbm %s851_s5, 128 }
 0x3f6   :  { %p636_p7 = scmp.ne.s32.totalorder %s851_s5, %s635_s4  ;;  %p639_p8 = scmp.lt.u32.totalorder %s635_s4, %s851_s5 }
 0x3f8   :  { %p641_p9 = pnand %p639_p8, %p636_p7 }
 0x3fa   :  { %644 = shalt.err (!%p641_p9)
}
 0x3fb   :  { %456 = dma.vmem_to_hbm [thread:$0]  %s454_s12, 128, %s851_s5, [#allocation4]  }
 0x3fc   :  { %649 = dma.done.wait [#allocation4], 128  }
 0x3fd   :  { %650 = vsyncadd [#allocation4], 4294967168 }
 0x3fe   :  { %460 = vsyncpa [#allocation3], 1 }
 0x3ff   :  { %461 = vsyncpa [#allocation6], 1 }
 0x400   :  { %462 = vsyncpa [#allocation4], 1 }

</bundles_post_ra>
